<compile_context>
chip_gen: v6e
topology: v6e:2x2x1
jax: 0.10.0
libtpu: 0.0.40
codegen_flags: <defaults>
</compile_context>

<pallas_src>
import functools

import numpy as np
import jax
import jax.numpy as jnp
from jax.experimental import pallas as pl
from jax.experimental.pallas import tpu as pltpu


# murmur3 fmix32 constants, written as their int32 (wrapped) values.
_GOLDEN = np.int32(-1640531527)   # 0x9E3779B9
_C1 = np.int32(-2048144789)       # 0x85EBCA6B
_C2 = np.int32(-1028477387)       # 0xC2B2AE35


def _srl(x, n):
    """Logical shift-right by n on int32 (arithmetic shift + mask)."""
    return (x >> n) & ((1 << (32 - n)) - 1)


# ----------------------------------------------------------------------------
# Kernels
# ----------------------------------------------------------------------------
def _ray_affine_kernel(params_ref, o_ref):
    """Covers 'fixed' and 'cellular' modes.

    params_ref: SMEM f32[4] = [x_dsr, y_dsr, x_off, y_off]
    o_ref:      VMEM (H, 2*W) interleaved output:
                  o[i, 2j]   = j * x_dsr + x_off   (x coordinate)
                  o[i, 2j+1] = i * y_dsr + y_off   (y coordinate)
    """
    h, w2 = o_ref.shape
    x_dsr = params_ref[0]
    y_dsr = params_ref[1]
    x_off = params_ref[2]
    y_off = params_ref[3]

    k = jax.lax.broadcasted_iota(jnp.int32, (h, w2), 1)     # lane index
    row = jax.lax.broadcasted_iota(jnp.int32, (h, w2), 0)   # sublane / row index
    col = k >> 1                                            # pixel column j = k // 2

    x = col.astype(jnp.float32) * x_dsr + x_off
    y = row.astype(jnp.float32) * y_dsr + y_off
    o_ref[...] = jnp.where((k & 1) == 0, x, y)


def _ray_random_kernel(seed_ref, o_ref, *, img_w, img_h):
    """Covers 'random' mode: uniform [0,1) scaled by image size, interleaved layout.

    seed_ref: SMEM i32[1]
    o_ref:    VMEM (H, 2*W): even lanes ~ U[0, img_w), odd lanes ~ U[0, img_h)
    """
    h, w2 = o_ref.shape
    k = jax.lax.broadcasted_iota(jnp.int32, (h, w2), 1)
    row = jax.lax.broadcasted_iota(jnp.int32, (h, w2), 0)
    idx = row * w2 + k

    # murmur3 fmix32 of (idx, seed) -- int32 arithmetic wraps, shifts are logical.
    x = idx + seed_ref[0] * _GOLDEN
    x = x ^ _srl(x, 16)
    x = x * _C1
    x = x ^ _srl(x, 13)
    x = x * _C2
    x = x ^ _srl(x, 16)

    # top 24 bits -> uniform [0, 1)
    u = _srl(x, 8).astype(jnp.float32) * jnp.float32(1.0 / (1 << 24))
    scale = jnp.where((k & 1) == 0, jnp.float32(img_w), jnp.float32(img_h))
    o_ref[...] = u * scale


# ----------------------------------------------------------------------------
# Jitted launch builders (one executable per mode; reshape fuses in, free view)
# ----------------------------------------------------------------------------
def _build_affine_fn(H, W):
    call = pl.pallas_call(
        _ray_affine_kernel,
        out_shape=jax.ShapeDtypeStruct((H, 2 * W), jnp.float32),
        in_specs=[pl.BlockSpec(memory_space=pltpu.MemorySpace.SMEM)],
        out_specs=pl.BlockSpec(memory_space=pltpu.MemorySpace.VMEM),
    )

    @jax.jit
    def run(params):
        # (H, 2W) -> (H*W, 2): row-major, zero data movement.
        return call(params).reshape(H * W, 2)

    return run


def _build_random_fn(H, W, img_w, img_h):
    kernel = functools.partial(
        _ray_random_kernel, img_w=float(img_w), img_h=float(img_h)
    )
    call = pl.pallas_call(
        kernel,
        out_shape=jax.ShapeDtypeStruct((H, 2 * W), jnp.float32),
        in_specs=[pl.BlockSpec(memory_space=pltpu.MemorySpace.SMEM)],
        out_specs=pl.BlockSpec(memory_space=pltpu.MemorySpace.VMEM),
    )

    @jax.jit
    def run(seed_arr):
        return call(seed_arr).reshape(H * W, 2)

    return run


# ----------------------------------------------------------------------------
# Module wrapper
# ----------------------------------------------------------------------------
class RaySamplerPallas:
    def __init__(
        self,
        ray_sample_mode="fixed",
        ray_number=(16, 128),
        ray_img_size=(64, 512),
        ray_upper_crop=0,
        ray_x_dsr_max=None,
        ray_y_dsr_max=None,
    ):
        assert ray_sample_mode in ["fixed", "cellular", "random"]
        self.ray_sample_mode = ray_sample_mode
        self.ray_resize = tuple(ray_number)
        self.ray_number = ray_number[0] * ray_number[1]
        self.ray_img_size = tuple(ray_img_size)
        self._last_cellular_params = None

        H, W = self.ray_resize
        if ray_sample_mode in ("fixed", "cellular"):
            self._affine_fn = _build_affine_fn(H, W)
        else:
            self._random_fn = _build_random_fn(H, W, ray_img_size[1], ray_img_size[0])

        if ray_sample_mode == "fixed":
            self.ray_x_dsr = 1.0 * ray_img_size[1] / ray_number[1]
            self.ray_y_dsr = 1.0 * ray_img_size[0] / ray_number[0]
            # PyTorch precomputes the fixed grid once (register_buffer) -> same here.
            self._fixed_rays = self._affine_fn(
                jnp.array([self.ray_x_dsr, self.ray_y_dsr, 0.0, 0.0], jnp.float32)
            )
        elif ray_sample_mode == "cellular":
            self.ray_upper_crop = ray_upper_crop
            self.ray_x_dsr_max = 1.0 * ray_img_size[1] / ray_number[1]
            self.ray_y_dsr_max = (
                1.0 * (ray_img_size[0] - ray_upper_crop) / ray_number[0]
            )
            if ray_x_dsr_max is not None:
                self.ray_x_dsr_max = ray_x_dsr_max
            if ray_y_dsr_max is not None:
                self.ray_y_dsr_max = ray_y_dsr_max
            assert self.ray_x_dsr_max > 1 and self.ray_y_dsr_max > 1
            # deterministic host-side RNG standing in for np.random.uniform()
            self._np_rng = np.random.default_rng(0)

    # ---- forward ---------------------------------------------------------
    def __call__(self, seed=0):
        if self.ray_sample_mode == "fixed":
            return self._fixed_rays
        elif self.ray_sample_mode == "random":
            return self._random_fn(jnp.array([seed], dtype=jnp.int32))
        else:  # cellular: host-side scalar draws mirror the PyTorch np.random calls
            ray_x_dsr = self._np_rng.uniform() * (self.ray_x_dsr_max - 1) + 1
            ray_y_dsr = self._np_rng.uniform() * (self.ray_y_dsr_max - 1) + 1
            ray_x_emp_max = self.ray_img_size[1] - self.ray_resize[1] * ray_x_dsr
            ray_y_emp_max = (
                self.ray_img_size[0]
                - self.ray_upper_crop
                - self.ray_resize[0] * ray_y_dsr
            )
            ray_x_emp = self._np_rng.uniform() * ray_x_emp_max
            ray_y_emp = self._np_rng.uniform() * ray_y_emp_max
            self._last_cellular_params = (
                ray_x_dsr,
                ray_y_dsr,
                ray_x_emp,
                ray_y_emp + self.ray_upper_crop,
            )
            return self._affine_fn(
                jnp.array(self._last_cellular_params, dtype=jnp.float32)
            )


# ----------------------------------------------------------------------------
# NumPy reference (mirrors the PyTorch semantics exactly)
# ----------------------------------------------------------------------------
def _ref_affine(H, W, x_dsr, y_dsr, x_off, y_off):
    x = np.arange(W, dtype=np.float32) * np.float32(x_dsr) + np.float32(x_off)
    y = np.arange(H, dtype=np.float32) * np.float32(y_dsr) + np.float32(y_off)
    rays = np.stack(
        [np.broadcast_to(x[None, :], (H, W)), np.broadcast_to(y[:, None], (H, W))],
        axis=-1,
    )
    return rays.reshape(H * W, 2)


if __name__ == "__main__":
    key = jax.random.PRNGKey(0)

    # small shapes consistent with the module (H=16 rows, W=128 cols)
    H, W = 16, 128
    img_H, img_W = 64, 512

    # --- fixed mode -------------------------------------------------------
    sampler_fixed = RaySamplerPallas(
        ray_sample_mode="fixed", ray_number=(H, W), ray_img_size=(img_H, img_W)
    )
    rays_fixed = jax.block_until_ready(sampler_fixed())
    ref_fixed = _ref_affine(H, W, img_W / W, img_H / H, 0.0, 0.0)
    assert rays_fixed.shape == (H * W, 2) and rays_fixed.dtype == jnp.float32
    np.testing.assert_allclose(
        np.asarray(rays_fixed), ref_fixed, rtol=1e-5, atol=1e-4
    )

    # --- cellular mode ----------------------------------------------------
    sampler_cell = RaySamplerPallas(
        ray_sample_mode="cellular",
        ray_number=(H, W),
        ray_img_size=(img_H, img_W),
        ray_upper_crop=8,
    )
    rays_cell = jax.block_until_ready(sampler_cell())
    xd, yd, xo, yo = sampler_cell._last_cellular_params
    ref_cell = _ref_affine(H, W, xd, yd, xo, yo)
    assert rays_cell.shape == (H * W, 2)
    np.testing.assert_allclose(
        np.asarray(rays_cell), ref_cell, rtol=1e-5, atol=1e-3
    )

    # --- random mode (distributional; check shape + range only) -----------
    seed = int(jax.random.randint(key, (), 0, 2**31 - 1))
    sampler_rand = RaySamplerPallas(
        ray_sample_mode="random", ray_number=(H, W), ray_img_size=(img_H, img_W)
    )
    rays_rand = jax.block_until_ready(sampler_rand(seed=seed))
    assert rays_rand.shape == (H * W, 2)
    rr = np.asarray(rays_rand)
    assert (rr[:, 0] >= 0).all() and (rr[:, 0] < img_W).all()
    assert (rr[:, 1] >= 0).all() and (rr[:, 1] < img_H).all()
    # basic sanity: values are not all identical
    assert np.unique(rr[:, 0]).size > 100 and np.unique(rr[:, 1]).size > 100

    print("KERNEL_OK")
</pallas_src>

<mosaic_0001>
module attributes {stable_mosaic.version = 11 : i64} {
  func.func @_ray_affine_kernel(%arg0: memref<4xf32, #tpu.memory_space<smem>>, %arg1: memref<16x256xf32, #tpu.memory_space<vmem>>) attributes {dimension_semantics = [], scalar_prefetch = 0 : i64, scratch_operands = 0 : i64, tpu.core_type = #tpu.core_type<tc>} {
    %c0 = arith.constant 0 : index
    %0 = memref.load %arg0[%c0] : memref<4xf32, #tpu.memory_space<smem>>
    %c1 = arith.constant 1 : index
    %1 = memref.load %arg0[%c1] : memref<4xf32, #tpu.memory_space<smem>>
    %c2 = arith.constant 2 : index
    %2 = memref.load %arg0[%c2] : memref<4xf32, #tpu.memory_space<smem>>
    %c3 = arith.constant 3 : index
    %3 = memref.load %arg0[%c3] : memref<4xf32, #tpu.memory_space<smem>>
    %4 = tpu.iota {dimensions = array<i32: 1>} : vector<16x256xi32>
    %5 = tpu.iota {dimensions = array<i32: 0>} : vector<16x256xi32>
    %c1_i32 = arith.constant 1 : i32
    %6 = vector.broadcast %c1_i32 : i32 to vector<16x256xi32>
    %7 = arith.shrsi %4, %6 : vector<16x256xi32>
    %8 = arith.sitofp %7 : vector<16x256xi32> to vector<16x256xf32>
    %9 = vector.broadcast %0 : f32 to vector<16x256xf32>
    %10 = arith.mulf %8, %9 : vector<16x256xf32>
    %11 = vector.broadcast %2 : f32 to vector<16x256xf32>
    %12 = arith.addf %10, %11 : vector<16x256xf32>
    %13 = arith.sitofp %5 : vector<16x256xi32> to vector<16x256xf32>
    %14 = vector.broadcast %1 : f32 to vector<16x256xf32>
    %15 = arith.mulf %13, %14 : vector<16x256xf32>
    %16 = vector.broadcast %3 : f32 to vector<16x256xf32>
    %17 = arith.addf %15, %16 : vector<16x256xf32>
    %c1_i32_0 = arith.constant 1 : i32
    %18 = vector.broadcast %c1_i32_0 : i32 to vector<16x256xi32>
    %19 = arith.andi %4, %18 : vector<16x256xi32>
    %c0_i32 = arith.constant 0 : i32
    %20 = vector.broadcast %c0_i32 : i32 to vector<16x256xi32>
    %21 = arith.cmpi eq, %19, %20 : vector<16x256xi32>
    %22 = arith.select %21, %12, %17 : vector<16x256xi1>, vector<16x256xf32>
    %c0_1 = arith.constant 0 : index
    %c0_2 = arith.constant 0 : index
    %23 = vector.load %arg1[%c0_1, %c0_2] : memref<16x256xf32, #tpu.memory_space<vmem>>, vector<16x256xf32>
    tpu.vector_store %arg1[%c0_1, %c0_2], %22 {strides = array<i32>} : memref<16x256xf32, #tpu.memory_space<vmem>>, vector<16x256xf32>,
    return
  }
}

</mosaic_0001>

<bundles_post_ra>
// kernel: run.1
= control target key start
LH: loop header
LB: loop body
LE: loop exit
PB: predicated region body
PF: predicated region fallthrough
CT: control target
= control target key end

     0   :  { %6 = vsyncpa [#allocation3], 0  ;;  %s78_s6 = smov [#allocation2]   ;;  %s104_s0 = inlined_call_operand.hbm [shape: f32[4], index: 0, kind: input, shape index: {}]   ;;  %s105_s1 = inlined_call_operand.vmem [shape: f32[16,256], index: 1, kind: output, shape index: {}]  }
   0x1   :  { %14 = dma.hbm_to_smem %s104_s0, 16, %s78_s6, [#allocation3]  }
   0x2   :  { %76 = dma.done.wait [#allocation3], 16  }
   0x3   :  { %77 = vsyncadd [#allocation3], 4294967280 }
   0x4   :  { %18 = sfence }
   0x5   :  { %s19_s9 = sld [smem:[#allocation2]]  ;;  %v23_v0 = vlaneseq }
   0x6   :  { %s64_s10 = sld [smem:[#allocation2 + $0x1]] }
   0x7   :  { %s65_s11 = sld [smem:[#allocation2 + $0x2]]  ;;  %v24_v1 = vand.u32 127, %v23_v0  ;;  %v27_v2 = vshrl.u32 %v23_v0, 7 }
   0x8   :  { %s66_s12 = sld [smem:[#allocation2 + $0x3]] }
   0x9   :  { %v29_v3 = vshra.s32 %v24_v1, 1  ;;  %v39_v4 = vcvt.s32.f32 %v27_v2  ;;  %v25_v5 = vadd.s32 128, %v24_v1  ;;  %v47_v6 = vand.u32 1, %v24_v1 }
   0xa   :  { %v28_v7 = vadd.s32 8, %v27_v2 }
   0xb   :  { %v31_v8 = vcvt.s32.f32 %v29_v3  ;;  %v33_v9 = vstv %s19_s9  ;;  %v30_v10 = vshra.s32 %v25_v5, 1  ;;  %v48_v12 = vand.u32 1, %v25_v5 }
   0xc   :  { %v41_v11 = vstv %s64_s10  ;;  %v40_v13 = vcvt.s32.f32 %v28_v7  ;;  %vm49_vm0 = vcmp.eq.s32.totalorder %v47_v6, 0 }
   0xd   :  { %v34_v14 = vmul.f32 %v33_v9, %v31_v8  ;;  %v36_v15 = vstv %s65_s11  ;;  %v42_v16 = vmul.f32 %v41_v11, %v39_v4  ;;  %v32_v17 = vcvt.s32.f32 %v30_v10 }
   0xe   :  { %v44_v18 = vstv %s66_s12  ;;  %v43_v19 = vmul.f32 %v41_v11, %v40_v13  ;;  %vm50_vm1 = vcmp.eq.s32.totalorder %v48_v12, 0 }
   0xf   :  { %v37_v20 = vadd.f32 %v36_v15, %v34_v14  ;;  %v45_v21 = vadd.f32 %v44_v18, %v42_v16  ;;  %v35_v22 = vmul.f32 %v33_v9, %v32_v17 }
  0x10   :  { %v46_v23 = vadd.f32 %v44_v18, %v43_v19 }
  0x11   :  { %v51_v24 = vsel %vm49_vm0, %v37_v20, %v45_v21  ;;  %v38_v25 = vadd.f32 %v36_v15, %v35_v22 }
  0x12   :  { %55 = vst [vmem:[%s105_s1] sm:$0xff] %v51_v24  ;;  %v53_v26 = vsel %vm49_vm0, %v37_v20, %v46_v23 }
  0x13   :  { %v52_v27 = vsel %vm50_vm1, %v38_v25, %v45_v21  ;;  %57 = vst [vmem:[%s105_s1 + $0x10] sm:$0xff] %v53_v26  ;;  %v54_v28 = vsel %vm50_vm1, %v38_v25, %v46_v23 }
  0x14   :  { %56 = vst [vmem:[%s105_s1 + $0x8] sm:$0xff] %v52_v27  ;;  %58 = vst [vmem:[%s105_s1 + $0x18] sm:$0xff] %v54_v28 }
  0x15   :  { %63 = vsyncpa [#allocation3], 1 }

</bundles_post_ra>
